<compile_context>
chip_gen: v6e
topology: v6e:2x2x1
jax: 0.10.0
libtpu: 0.0.40
codegen_flags: <defaults>
</compile_context>

<pallas_src>
import functools

import jax
import jax.numpy as jnp
from jax.experimental import pallas as pl
from jax.experimental.pallas import tpu as pltpu

_LANE = 128
_SUBLANE = 8
# Conservative per-call VMEM working-set budget: fits under the default scoped
# VMEM limit on every generation (v5e 16 MiB, v6e 32 MiB, v7x 32 MiB of its
# 64 MiB physical) with headroom for Mosaic's internal scratch.
_VMEM_BUDGET = 12 * 1024 * 1024


def _round_up(n, m):
    return ((n + m - 1) // m) * m


def _coupling_kernel(x_ref, w1_ref, b1_ref, *rest, half_dim, out_dim,
                     hidden_split, fuse_w2):
    """One batch tile of the affine coupling layer.

    Emits the full-width y tile (x1 passthrough written from the x tile that
    is already VMEM-resident -> single lane-dense store, no wrapper concat)
    plus log_det. Matmul operands are bf16 (MXU-native on v5e/v6e/v7x);
    accumulation and all elementwise math stay f32.
    """
    if fuse_w2:
        w2_ref, b2_ref, y_ref, logdet_ref = rest
    else:
        w2s_ref, b2s_ref, w2t_ref, b2t_ref, y_ref, logdet_ref = rest

    x = x_ref[...]
    x1 = x[:, :half_dim]
    x2 = x[:, half_dim:]

    # Fused first layers of the scale & translate nets: one MXU pass.
    h = jnp.dot(x1.astype(jnp.bfloat16), w1_ref[...],
                preferred_element_type=jnp.float32) + b1_ref[...]
    h = jnp.maximum(h, 0.0)
    h_bf = h.astype(jnp.bfloat16)

    if fuse_w2:
        # Small dims (2*hidden, 2*out <= 128): block-diagonal second layer in
        # one MXU pass -- the zero blocks sit inside MXU tile padding.
        st = jnp.dot(h_bf, w2_ref[...],
                     preferred_element_type=jnp.float32) + b2_ref[...]
        s = jnp.tanh(st[:, :out_dim])
        t = st[:, out_dim:]
    else:
        # Larger dims: two separate matmuls (block-diag would double MACs and
        # weight VMEM). hidden_split is a multiple of 128 so the h slices are
        # lane-aligned (no relayout).
        s = jnp.tanh(jnp.dot(h_bf[:, :hidden_split], w2s_ref[...],
                             preferred_element_type=jnp.float32) + b2s_ref[...])
        t = jnp.dot(h_bf[:, hidden_split:], w2t_ref[...],
                    preferred_element_type=jnp.float32) + b2t_ref[...]

    y2 = x2 * jnp.exp(s) + t
    y_ref[...] = jnp.concatenate([x1, y2], axis=1).astype(y_ref.dtype)
    logdet_ref[...] = jnp.sum(s, axis=1, keepdims=True)


def make_params(key, input_dim, hidden_dim, dtype=jnp.float32):
    """nn.Linear-style init: U(-1/sqrt(fan_in), 1/sqrt(fan_in)).
    Weights stored as (in_features, out_features)."""
    half_dim = input_dim // 2
    out_dim = input_dim - half_dim

    def linear(key, fan_in, fan_out):
        kw, kb = jax.random.split(key)
        bound = 1.0 / float(fan_in) ** 0.5
        w = jax.random.uniform(kw, (fan_in, fan_out), dtype, -bound, bound)
        b = jax.random.uniform(kb, (1, fan_out), dtype, -bound, bound)
        return w, b

    k1, k2, k3, k4 = jax.random.split(key, 4)
    w1s, b1s = linear(k1, half_dim, hidden_dim)
    w2s, b2s = linear(k2, hidden_dim, out_dim)
    w1t, b1t = linear(k3, half_dim, hidden_dim)
    w2t, b2t = linear(k4, hidden_dim, out_dim)
    return dict(w1s=w1s, b1s=b1s, w2s=w2s, b2s=b2s,
                w1t=w1t, b1t=b1t, w2t=w2t, b2t=b2t)


def _fuse_params(params):
    """Fuse the scale / translate nets and pre-cast weights to bf16.

    First layers are always concatenated horizontally ([w1s | w1t]) -> one MXU
    pass with no wasted MACs. Second layers become a block-diagonal matrix
    only when both operands fit one MXU tile (<=128, safe on v5e too);
    otherwise they stay separate and hidden is zero-padded to a multiple of
    128 so the in-kernel split of h is lane-aligned.
    """
    w1s, w1t = params["w1s"], params["w1t"]
    w2s, w2t = params["w2s"], params["w2t"]
    b1s, b1t = params["b1s"], params["b1t"]
    b2s, b2t = params["b2s"], params["b2t"]
    hidden, out_dim = w2s.shape

    fuse_w2 = (2 * hidden <= _LANE) and (2 * out_dim <= _LANE)

    if fuse_w2:
        w1 = jnp.concatenate([w1s, w1t], axis=1)                  # (half, 2H)
        b1 = jnp.concatenate([b1s, b1t], axis=1)                  # (1, 2H)
        zero = jnp.zeros((hidden, out_dim), w2s.dtype)
        w2 = jnp.block([[w2s, zero], [zero, w2t]])                # (2H, 2*out)
        b2 = jnp.concatenate([b2s, b2t], axis=1)                  # (1, 2*out)
        second = (w2.astype(jnp.bfloat16), b2)
        hidden_split = hidden
    else:
        hidden_split = _round_up(hidden, _LANE)
        pad = hidden_split - hidden
        zc = jnp.zeros((w1s.shape[0], pad), w1s.dtype)
        zb = jnp.zeros((1, pad), b1s.dtype)
        zr = jnp.zeros((pad, out_dim), w2s.dtype)
        w1 = jnp.concatenate([w1s, zc, w1t, zc], axis=1)          # (half, 2Hp)
        b1 = jnp.concatenate([b1s, zb, b1t, zb], axis=1)          # (1, 2Hp)
        second = (jnp.concatenate([w2s, zr], axis=0).astype(jnp.bfloat16), b2s,
                  jnp.concatenate([w2t, zr], axis=0).astype(jnp.bfloat16), b2t)

    return w1.astype(jnp.bfloat16), b1, second, hidden_split, fuse_w2


def cnn_affine_coupling_forward(x, params, *, tile_b=1024):
    """Equivalent of CNNAffineCouplingLayer.forward: returns (y, log_det)."""
    batch, input_dim = x.shape
    half_dim = input_dim // 2
    out_dim = input_dim - half_dim
    hidden = params["w2s"].shape[0]

    w1, b1, second, hidden_split, fuse_w2 = _fuse_params(params)
    weights = (w1, b1) + second
    hidden2 = w1.shape[1]
    out2 = 2 * out_dim

    # --- Generation-aware tile / grid selection --------------------------
    itemsize = x.dtype.itemsize
    # Per-row VMEM: double-buffered x & y tiles + logdet, f32 intermediates
    # (h, s/t) and the bf16 matmul operand copies.
    row_bytes = (2 * 2 * input_dim * itemsize + 2 * 4
                 + 4 * (hidden2 + out2) + 2 * (input_dim + hidden2))
    weight_bytes = sum(int(a.size) * a.dtype.itemsize for a in weights)
    weight_vmem = 2 * weight_bytes  # constant index map, still double-buffered
    tb_vmem = max(_SUBLANE,
                  ((_VMEM_BUDGET - weight_vmem) // row_bytes)
                  // _SUBLANE * _SUBLANE)
    tb_cap = max(_SUBLANE, min(tile_b, tb_vmem))
    # Use >=2 batch tiles whenever the batch allows so the "parallel" grid
    # axis can shard across both v7x TensorCores (no-op on v5e/v6e).
    n_tiles = max(pl.cdiv(batch, tb_cap), 2 if batch >= 2 * _SUBLANE else 1)
    tb = min(tb_cap, _round_up(pl.cdiv(batch, n_tiles), _SUBLANE))
    padded = _round_up(batch, tb)
    grid = (padded // tb,)

    x_in = x if padded == batch else jnp.pad(x, ((0, padded - batch), (0, 0)))

    # Useful FLOPs only (zero blocks / zero padding excluded).
    flops = 2 * padded * (half_dim * 2 * hidden + 2 * hidden * out_dim)
    transcendentals = 2 * padded * out_dim  # tanh + exp
    bytes_accessed = (itemsize * padded * input_dim * 2 + 4 * padded
                      + weight_bytes)
    vmem_limit = int(min(48 << 20,
                         max(16 << 20, 2 * (weight_vmem + tb * row_bytes))))

    kernel = functools.partial(_coupling_kernel, half_dim=half_dim,
                               out_dim=out_dim, hidden_split=hidden_split,
                               fuse_w2=fuse_w2)

    in_specs = ([pl.BlockSpec((tb, input_dim), lambda i: (i, 0))]
                # Weights/biases: full-array blocks with constant index_map ->
                # VMEM-resident across the whole grid.
                + [pl.BlockSpec(a.shape, lambda i: (0, 0)) for a in weights])

    y, logdet = pl.pallas_call(
        kernel,
        grid=grid,
        in_specs=in_specs,
        out_specs=(
            pl.BlockSpec((tb, input_dim), lambda i: (i, 0)),
            pl.BlockSpec((tb, 1), lambda i: (i, 0)),
        ),
        out_shape=(
            jax.ShapeDtypeStruct((padded, input_dim), x.dtype),
            jax.ShapeDtypeStruct((padded, 1), jnp.float32),
        ),
        compiler_params=pltpu.CompilerParams(
            dimension_semantics=("parallel",),
            vmem_limit_bytes=vmem_limit),
        cost_estimate=pl.CostEstimate(
            flops=flops,
            transcendentals=transcendentals,
            bytes_accessed=bytes_accessed),
    )(x_in, *weights)

    return y[:batch], logdet[:batch, 0]


def _reference_forward(x, params, matmul_dtype=jnp.float32):
    """Pure-JAX reference; matmul_dtype=bf16 mirrors the kernel's MXU inputs."""
    half_dim = x.shape[1] // 2
    x1, x2 = x[:, :half_dim], x[:, half_dim:]
    md = matmul_dtype

    def mlp(w1, b1, w2, b2):
        h = jnp.maximum(
            jnp.dot(x1.astype(md), w1.astype(md),
                    preferred_element_type=jnp.float32) + b1, 0.0)
        return jnp.dot(h.astype(md), w2.astype(md),
                       preferred_element_type=jnp.float32) + b2

    s = jnp.tanh(mlp(params["w1s"], params["b1s"], params["w2s"], params["b2s"]))
    t = mlp(params["w1t"], params["b1t"], params["w2t"], params["b2t"])
    y2 = x2 * jnp.exp(s) + t
    return jnp.concatenate([x1, y2], axis=1), jnp.sum(s, axis=1)


def _check(x, params):
    y, log_det = cnn_affine_coupling_forward(x, params)
    jax.block_until_ready((y, log_det))
    assert y.shape == x.shape and log_det.shape == (x.shape[0],)
    # Semantic check against a reference with the same bf16 MXU operands.
    y_bf, ld_bf = _reference_forward(x, params, matmul_dtype=jnp.bfloat16)
    assert jnp.allclose(y, y_bf, atol=5e-3, rtol=5e-3)
    assert jnp.allclose(log_det, ld_bf, atol=5e-3, rtol=5e-3)
    # Full-f32 reference: loose tolerance accounts for bf16 matmul operands.
    y_ref, ld_ref = _reference_forward(x, params)
    assert jnp.allclose(y, y_ref, atol=1e-1, rtol=1e-1)
    assert jnp.allclose(log_det, ld_ref, atol=1e-1, rtol=1e-1)


if __name__ == "__main__":
    batch, input_dim, hidden_dim = 8, 16, 32

    key = jax.random.PRNGKey(0)
    kx, kp = jax.random.split(key)
    x = jax.random.normal(kx, (batch, input_dim), dtype=jnp.float32)
    params = make_params(kp, input_dim, hidden_dim)
    _check(x, params)  # fused block-diagonal second layer, single tile

    # Batch-padding / multi-tile path (batch not a multiple of the tile).
    x_odd = jax.random.normal(jax.random.PRNGKey(1), (19, input_dim),
                              jnp.float32)
    _check(x_odd, params)

    # Unfused (two-matmul, lane-aligned hidden split) second-layer path.
    params_big = make_params(jax.random.PRNGKey(2), input_dim, 160)
    _check(x, params_big)

    print("KERNEL_OK")
</pallas_src>

<mosaic_0001>
module attributes {stable_mosaic.version = 11 : i64} {
  func.func @_coupling_kernel(%arg0: i32, %arg1: memref<8x16xf32, #tpu.memory_space<vmem>>, %arg2: memref<8x64xbf16, #tpu.memory_space<vmem>>, %arg3: memref<1x64xf32, #tpu.memory_space<vmem>>, %arg4: memref<64x16xbf16, #tpu.memory_space<vmem>>, %arg5: memref<1x16xf32, #tpu.memory_space<vmem>>, %arg6: memref<8x16xf32, #tpu.memory_space<vmem>>, %arg7: memref<8x1xf32, #tpu.memory_space<vmem>>) attributes {dimension_semantics = [#tpu.dimension_semantics<parallel>], iteration_bounds = array<i64: 1>, scalar_prefetch = 0 : i64, scratch_operands = 0 : i64, tpu.core_type = #tpu.core_type<tc>, window_params = [{transform_indices = @transform_0, window_bounds = array<i64: 8, 16>}, {pipeline_mode = #tpu.pipeline_mode<synchronous>, transform_indices = @transform_1, window_bounds = array<i64: 8, 64>}, {pipeline_mode = #tpu.pipeline_mode<synchronous>, transform_indices = @transform_2, window_bounds = array<i64: 1, 64>}, {pipeline_mode = #tpu.pipeline_mode<synchronous>, transform_indices = @transform_3, window_bounds = array<i64: 64, 16>}, {pipeline_mode = #tpu.pipeline_mode<synchronous>, transform_indices = @transform_4, window_bounds = array<i64: 1, 16>}, {transform_indices = @transform_5, window_bounds = array<i64: 8, 16>}, {transform_indices = @transform_6, window_bounds = array<i64: 8, 1>}]} {
    %c0 = arith.constant 0 : index
    %c0_0 = arith.constant 0 : index
    %0 = vector.load %arg1[%c0, %c0_0] : memref<8x16xf32, #tpu.memory_space<vmem>>, vector<8x16xf32>
    %1 = vector.extract_strided_slice %0 {offsets = [0, 0], sizes = [8, 8], strides = [1, 1]} : vector<8x16xf32> to vector<8x8xf32>
    %2 = vector.extract_strided_slice %0 {offsets = [0, 8], sizes = [8, 8], strides = [1, 1]} : vector<8x16xf32> to vector<8x8xf32>
    %3 = arith.truncf %1 : vector<8x8xf32> to vector<8x8xbf16>
    %c0_1 = arith.constant 0 : index
    %c0_2 = arith.constant 0 : index
    %4 = vector.load %arg2[%c0_1, %c0_2] : memref<8x64xbf16, #tpu.memory_space<vmem>>, vector<8x64xbf16>
    %cst = arith.constant dense<0.000000e+00> : vector<8x64xf32>
    %5 = tpu.matmul %3, %4, %cst {dimension_numbers = #tpu.dot_dimension_numbers<[1], [0], [0], [1], [0, 0, 1, 1], [], []>} : vector<8x8xbf16>, vector<8x64xbf16>, vector<8x64xf32> -> vector<8x64xf32>
    %c0_3 = arith.constant 0 : index
    %c0_4 = arith.constant 0 : index
    %6 = vector.load %arg3[%c0_3, %c0_4] : memref<1x64xf32, #tpu.memory_space<vmem>>, vector<1x64xf32>
    %7 = vector.broadcast %6 : vector<1x64xf32> to vector<8x64xf32>
    %8 = arith.addf %5, %7 : vector<8x64xf32>
    %cst_5 = arith.constant 0.000000e+00 : f32
    %9 = vector.broadcast %cst_5 : f32 to vector<8x64xf32>
    %10 = arith.maximumf %8, %9 : vector<8x64xf32>
    %11 = arith.truncf %10 : vector<8x64xf32> to vector<8x64xbf16>
    %c0_6 = arith.constant 0 : index
    %c0_7 = arith.constant 0 : index
    %12 = vector.load %arg4[%c0_6, %c0_7] : memref<64x16xbf16, #tpu.memory_space<vmem>>, vector<64x16xbf16>
    %cst_8 = arith.constant dense<0.000000e+00> : vector<8x16xf32>
    %13 = tpu.matmul %11, %12, %cst_8 {dimension_numbers = #tpu.dot_dimension_numbers<[1], [0], [0], [1], [0, 0, 1, 1], [], []>} : vector<8x64xbf16>, vector<64x16xbf16>, vector<8x16xf32> -> vector<8x16xf32>
    %c0_9 = arith.constant 0 : index
    %c0_10 = arith.constant 0 : index
    %14 = vector.load %arg5[%c0_9, %c0_10] : memref<1x16xf32, #tpu.memory_space<vmem>>, vector<1x16xf32>
    %15 = vector.broadcast %14 : vector<1x16xf32> to vector<8x16xf32>
    %16 = arith.addf %13, %15 : vector<8x16xf32>
    %17 = vector.extract_strided_slice %16 {offsets = [0, 0], sizes = [8, 8], strides = [1, 1]} : vector<8x16xf32> to vector<8x8xf32>
    %18 = math.tanh %17 : vector<8x8xf32>
    %19 = vector.extract_strided_slice %16 {offsets = [0, 8], sizes = [8, 8], strides = [1, 1]} : vector<8x16xf32> to vector<8x8xf32>
    %20 = math.exp %18 : vector<8x8xf32>
    %21 = arith.mulf %2, %20 : vector<8x8xf32>
    %22 = arith.addf %21, %19 : vector<8x8xf32>
    %23 = tpu.concatenate %1, %22 in 1 : vector<8x8xf32>, vector<8x8xf32> -> vector<8x16xf32>
    %c0_11 = arith.constant 0 : index
    %c0_12 = arith.constant 0 : index
    %24 = vector.load %arg6[%c0_11, %c0_12] : memref<8x16xf32, #tpu.memory_space<vmem>>, vector<8x16xf32>
    tpu.vector_store %arg6[%c0_11, %c0_12], %23 {strides = array<i32>} : memref<8x16xf32, #tpu.memory_space<vmem>>, vector<8x16xf32>,
    %cst_13 = arith.constant dense<0.000000e+00> : vector<8xf32>
    %25 = vector.multi_reduction <add>, %18, %cst_13 [1] : vector<8x8xf32> to vector<8xf32>
    %26 = vector.shape_cast %25 : vector<8xf32> to vector<8x1xf32>
    %c0_14 = arith.constant 0 : index
    %c0_15 = arith.constant 0 : index
    %27 = vector.load %arg7[%c0_14, %c0_15] : memref<8x1xf32, #tpu.memory_space<vmem>>, vector<8x1xf32>
    tpu.vector_store %arg7[%c0_14, %c0_15], %26 {strides = array<i32>} : memref<8x1xf32, #tpu.memory_space<vmem>>, vector<8x1xf32>,
    return
  }
  func.func @transform_0(%arg0: i32) -> (i32, i32) {
    %c0_i32 = arith.constant 0 : i32
    %c0_i32_0 = arith.constant 0 : i32
    return %arg0, %c0_i32 : i32, i32
  }
  func.func @transform_1(%arg0: i32) -> (i32, i32) {
    %c0_i32 = arith.constant 0 : i32
    %c0_i32_0 = arith.constant 0 : i32
    %c0_i32_1 = arith.constant 0 : i32
    return %c0_i32, %c0_i32_0 : i32, i32
  }
  func.func @transform_2(%arg0: i32) -> (i32, i32) {
    %c0_i32 = arith.constant 0 : i32
    %c0_i32_0 = arith.constant 0 : i32
    %c0_i32_1 = arith.constant 0 : i32
    return %c0_i32, %c0_i32_0 : i32, i32
  }
  func.func @transform_3(%arg0: i32) -> (i32, i32) {
    %c0_i32 = arith.constant 0 : i32
    %c0_i32_0 = arith.constant 0 : i32
    %c0_i32_1 = arith.constant 0 : i32
    return %c0_i32, %c0_i32_0 : i32, i32
  }
  func.func @transform_4(%arg0: i32) -> (i32, i32) {
    %c0_i32 = arith.constant 0 : i32
    %c0_i32_0 = arith.constant 0 : i32
    %c0_i32_1 = arith.constant 0 : i32
    return %c0_i32, %c0_i32_0 : i32, i32
  }
  func.func @transform_5(%arg0: i32) -> (i32, i32) {
    %c0_i32 = arith.constant 0 : i32
    %c0_i32_0 = arith.constant 0 : i32
    return %arg0, %c0_i32 : i32, i32
  }
  func.func @transform_6(%arg0: i32) -> (i32, i32) {
    %c0_i32 = arith.constant 0 : i32
    %c0_i32_0 = arith.constant 0 : i32
    return %arg0, %c0_i32 : i32, i32
  }
}

</mosaic_0001>

<bundles_post_ra>
// kernel: tpu_custom_call.1
= control target key start
LH: loop header
LB: loop body
LE: loop exit
PB: predicated region body
PF: predicated region fallthrough
CT: control target
= control target key end

     0   :  { %vm38_vm0 = vcmask 1043456   ;;  %v269_v2 = vmov 0.0   ;;  %vm270_vm1 = vmmov 0   ;;  %vm34_vm2 = vcmask 64512   ;;  %s341_s0 = inlined_call_operand.vmem [shape: f32[8,16], index: 0, kind: input, shape index: {}]   ;;  %s342_s1 = inlined_call_operand.vmem [shape: bf16[8,64], index: 1, kind: input, shape index: {}]   ;;  %s343_s2 = inlined_call_operand.vmem [shape: f32[1,64], index: 2, kind: input, shape index: {}]   ;;  %s344_s3 = inlined_call_operand.vmem [shape: bf16[64,16], index: 3, kind: input, shape index: {}]   ;;  %s345_s4 = inlined_call_operand.vmem [shape: f32[1,16], index: 4, kind: input, shape index: {}]   ;;  %s346_s5 = inlined_call_operand.hbm [shape: f32[8,16], index: 5, kind: output, shape index: {0}]   ;;  %s347_s6 = inlined_call_operand.vmem [shape: f32[8,1], index: 6, kind: output, shape index: {1}]  }
   0x1   :  { %v26_v0 = vld [vmem:[%s342_s1] sm:$0xf]  ;;  %217 = vmatprep.subr.bf16.mxu0 %v269_v2  ;;  %219 = vmatprep.mubr.msk.bf16.mxu0 %vm270_vm1, %v269_v2  ;;  %v239_v5 = vld [vmem:[%s344_s3 + $0x18] sm:$0xff]   ;;  %v240_v6 = vld [vmem:[%s344_s3 + $0x10] sm:$0xff]  }
   0x2   :  { %v24_v1 = vld [vmem:[%s341_s0] sm:$0xff]  ;;  %v40_v3 = vsel %vm38_vm0, %v26_v0, 0  ;;  %223 = vmatprep.subr.bf16.mxu1 %v269_v2  ;;  %231 = vmatprep.mubr.msk.bf16.mxu1 %vm270_vm1, %v269_v2 }
   0x3   :  { %v25_v4 = vpack.c.bf16 %v24_v1, %v24_v1  ;;  %218 = vmatpush3.bf16.msra.mxu0 %v40_v3  ;;  %224 = vmatpush3.bf16.msra.mxu1 %v239_v5 }
   0x4   :  { %225 = vmatprep.subr.bf16.mxu1 %v269_v2 }
   0x6   :  { %220 = vmatmul.mubr.msk.bf16.vlgmr.msra.gmra.mxu0 %vm34_vm2, %v25_v4 }
   0x7   :  { %12 = vsyncpa [#allocation3], 0  ;;  %226 = vmatpush3.bf16.msra.mxu1 %v240_v6  ;;  %v241_v7 = vld [vmem:[%s344_s3 + $0x8] sm:$0xff]   ;;  %v242_v8 = vld [vmem:[%s344_s3] sm:$0xff]   ;;  %vm123_vm3 = vcmask 523264   ;;  %vm182_vm4 = vcmask 7168  }
   0x8   :  { %227 = vmatprep.subr.bf16.mxu1 %v269_v2  ;;  %v202_v9 = vld [vmem:[%s343_s2] ss:$0 sm:$0xff]  ;;  %s271_s2 = smov 8   ;;  %vm177_vm5 = vcmask 130048  }
   0x9   :  { %v204_v17 = vld [vmem:[%s345_s4] ss:$0 sm:$0xff]  ;;  %s272_s4 = smov [#allocation2]  }
   0xa   :  { %s190_s12 = sshll.u32 %s272_s4, 4  ;;  %s191_s12 = int_to_ptr.vmem [resolvable:$true] %s190_s12 }
   0xb   :  { %228 = vmatpush3.bf16.msra.mxu1 %v241_v7  ;;  %s247_s13 = scalar_lea.vmem %s191_s12, 128  ;;  %p252_p1 = scmp.lt.s32.totalorder %s191_s12, %s191_s12 }
   0xc   :  { %229 = vmatprep.subr.bf16.mxu1 %v269_v2  ;;  %p248_p0 = scmp.ne.s32.totalorder %s191_s12, %s247_s13  ;;  %p253_p2 = scmp.lt.s32.totalorder %s247_s13, %s247_s13 }
   0xe   :  { %p254_p3 = por %p253_p2, %p252_p1 }
   0xf   :  { %230 = vmatpush3.bf16.msra.mxu1 %v242_v8 }
  0x10   :  { %p255_p4 = pnand %p254_p3, %p248_p0 }
  0xc6   :  { %v76_v10 = vpop.f32.mrf.mxu0 }
  0xc7   :  { %v77_v11 = vadd.f32 %v202_v9, %v76_v10 }
  0xc8   :  { %v221_v12 = vpop.f32.mrf.mxu0 }
  0xc9   :  { %v82_v13 = vmax.f32 %v77_v11, 0.0 }
  0xca   :  { %v79_v14 = vpop.f32.mrf.mxu0 }
  0xcb   :  { %v83_v15 = vpack.c.bf16 %v82_v13, %v82_v13 }
  0xcc   :  { %v222_v16 = vpop.f32.mrf.mxu0 }
  0xcd   :  { %232 = vmatmul.mubr.msk.bf16.vlgmr.msra.gmra.mxu1 %vm123_vm3, %v83_v15 }
 0x18d   :  { %v161_v18 = vpop.f32.mrf.mxu1 }
 0x18e   :  { %v162_v19 = vadd.f32 %v204_v17, %v161_v18 }
 0x18f   :  { %v233_v20 = vpop.f32.mrf.mxu1 }
 0x190   :  { %243 = vtanh.f32 %v162_v19 }
 0x191   :  { %v164_v21 = vpop.f32.mrf.mxu1 }
 0x193   :  { %v234_v22 = vpop.f32.mrf.mxu1 }
 0x19d   :  { %v244_v23 = vpop.eup %243 }
 0x19e   :  { %v179_v24 = vsel %vm34_vm2, %v244_v23, 0.0  ;;  %v168_v25 = vmul.f32 1.442695, %v244_v23 }
 0x19f   :  { %180 = vadd.xlane.f32.xlu0 %v179_v24 }
 0x1a0   :  { %245 = vpow2.f32 %v168_v25 }
 0x1ad   :  { %v246_v26 = vpop.eup %245 }
 0x1b5   :  { %171 = vrot.lane.b32.xlu0 %v246_v26, %s271_s2 }
 0x228   :  { %v181_v27 = vpop.xlane.xlu0 %180 }
 0x229   :  { %183 = vst.msk [vmem:[%s347_s6] sm:$0xff] %vm182_vm4, %v181_v27 }
 0x22c   :  { %v172_v28 = vpop.permute.xlu0 %171 }
 0x22d   :  { %v174_v29 = vmul.f32 %v172_v28, %v24_v1 }
 0x22f   :  { %v175_v30 = vadd.f32 %v174_v29, %v162_v19 }
 0x231   :  { %v176_v31 = vsel %vm34_vm2, %v24_v1, %v175_v30 }
 0x232   :  { %178 = vst.msk [vmem:[#allocation2] sm:$0xff] %vm177_vm5, %v176_v31 }
 0x233   :  { %258 = shalt.err (!%p255_p4)
}
 0x234   :  { %193 = dma.vmem_to_hbm [thread:$0]  %s191_s12, 128, %s346_s5, [#allocation3]  }
 0x235   :  { %267 = dma.done.wait [#allocation3], 128  }
 0x236   :  { %268 = vsyncadd [#allocation3], 4294967168 }
 0x237   :  { %201 = vsyncpa [#allocation3], 1 }

</bundles_post_ra>
